<compile_context>
chip_gen: v5e
topology: v5e:2x2
jax: 0.10.0
libtpu: 0.0.40
codegen_flags: <defaults>
</compile_context>

<pallas_src>
import functools

import jax
import jax.numpy as jnp
from jax import lax
from jax.experimental import pallas as pl
from jax.experimental.pallas import tpu as pltpu

EPS = 1e-5
LANE = 128


def _round_up(x: int, m: int) -> int:
    return ((x + m - 1) // m) * m


# --------------------------------------------------------------------------
# Fused kernel
# --------------------------------------------------------------------------
def _bn_fold(y, gamma, beta, inv_n):
    """Training-mode BatchNorm1d via single-pass moments + folded affine."""
    s1 = jnp.sum(y, axis=0, keepdims=True)
    s2 = jnp.sum(y * y, axis=0, keepdims=True)
    mean = s1 * inv_n
    var = s2 * inv_n - mean * mean
    scale = gamma * lax.rsqrt(var + EPS)      # EUP rsqrt, gamma folded in
    shift = beta - mean * scale
    return y * scale + shift


def _fused_mlp_stack_kernel(x_ref, ws_ref, gammas_ref, betas_ref, o_ref,
                            *, num_layers: int, residual: bool,
                            residual_full: bool):
    n = x_ref.shape[0]
    inv_n = jnp.float32(1.0 / n)

    x = x_ref[...].astype(jnp.float32)        # (N, F_pad), stays resident on-chip
    h = x
    for i in range(num_layers):               # static unroll (tiny, fixed depth)
        w = ws_ref[i]                         # (F_pad, F_pad)
        y = jnp.dot(h, w, preferred_element_type=jnp.float32)   # MXU
        # NOTE: Linear bias intentionally omitted -- cancelled exactly by the
        # BatchNorm (training-mode) mean subtraction that follows.
        y = _bn_fold(y, gammas_ref[i], betas_ref[i], inv_n)
        y = jnp.maximum(y, 0.0)               # ReLU; Dropout(p=0) == identity
        if residual and (0 < i < num_layers - 1):   # middle blocks only
            y = y + h
        h = y

    if residual_full:
        h = h + x
    # Final BatchNorm1d uses slot `num_layers` of the stacked affines.
    h = _bn_fold(h, gammas_ref[num_layers], betas_ref[num_layers], inv_n)
    o_ref[...] = h.astype(o_ref.dtype)


# --------------------------------------------------------------------------
# Wrapper
# --------------------------------------------------------------------------
_VMEM = pl.BlockSpec(memory_space=pltpu.MemorySpace.VMEM)


def mlp_stack_forward(x, params, *, residual, residual_full):
    """Run the whole MLPStack forward in one fused pallas_call."""
    blocks = params["blocks"]
    n_layers = len(blocks)
    n, in_f = x.shape
    out_f = blocks[-1]["w"].shape[1]
    widths = [in_f] + [b["w"].shape[1] for b in blocks]
    f_pad = _round_up(max(widths), LANE)      # lane-dense common width

    # Pad everything to (…, F_pad); padded columns remain exactly 0 through
    # matmul (zero weight columns), BN, ReLU and residuals.
    x_p = jnp.pad(x, ((0, 0), (0, f_pad - in_f)))
    ws, gammas, betas = [], [], []
    for b in blocks:
        fi, fo = b["w"].shape
        ws.append(jnp.pad(b["w"], ((0, f_pad - fi), (0, f_pad - fo))))
        gammas.append(jnp.pad(b["gamma"], ((0, 0), (0, f_pad - fo)),
                              constant_values=1.0))
        betas.append(jnp.pad(b["beta"], ((0, 0), (0, f_pad - fo))))
    # Final BN affine rides in the same stacked arrays (slot n_layers):
    gammas.append(jnp.pad(params["final_gamma"], ((0, 0), (0, f_pad - out_f)),
                          constant_values=1.0))
    betas.append(jnp.pad(params["final_beta"], ((0, 0), (0, f_pad - out_f))))

    ws = jnp.stack(ws)                        # (L,   F_pad, F_pad)
    gammas = jnp.stack(gammas)                # (L+1, 1,     F_pad)
    betas = jnp.stack(betas)                  # (L+1, 1,     F_pad)

    kern = functools.partial(_fused_mlp_stack_kernel,
                             num_layers=n_layers, residual=residual,
                             residual_full=residual_full)

    flops = 2 * n * f_pad * f_pad * n_layers + 12 * n * f_pad * (n_layers + 1)
    bytes_in = sum(int(a.size) * a.dtype.itemsize
                   for a in (x_p, ws, gammas, betas))
    bytes_out = n * f_pad * 4
    ce = pl.CostEstimate(flops=flops,
                         transcendentals=(n_layers + 1) * f_pad,
                         bytes_accessed=bytes_in + bytes_out)

    out_p = pl.pallas_call(
        kern,
        out_shape=jax.ShapeDtypeStruct((n, f_pad), jnp.float32),
        in_specs=[_VMEM] * 4,
        out_specs=_VMEM,
        cost_estimate=ce,
    )(x_p, ws, gammas, betas)

    return out_p[:, :out_f]


# --------------------------------------------------------------------------
# Deterministic parameter construction (mimics nn.Linear init ranges)
# --------------------------------------------------------------------------
def make_params(key, input_size, hidden_size, output_size, depth):
    sizes = [(input_size, hidden_size)]
    sizes += [(hidden_size, hidden_size)] * (depth - 1)
    sizes += [(hidden_size, output_size)]

    blocks = []
    for (fin, fout) in sizes:
        key, kw, kb = jax.random.split(key, 3)
        bound = 1.0 / jnp.sqrt(fin)
        w = jax.random.uniform(kw, (fin, fout), jnp.float32, -bound, bound)
        b = jax.random.uniform(kb, (1, fout), jnp.float32, -bound, bound)
        gamma = jnp.ones((1, fout), jnp.float32)
        beta = jnp.zeros((1, fout), jnp.float32)
        blocks.append(dict(w=w, b=b, gamma=gamma, beta=beta))
    final_gamma = jnp.ones((1, output_size), jnp.float32)
    final_beta = jnp.zeros((1, output_size), jnp.float32)
    return dict(blocks=blocks, final_gamma=final_gamma, final_beta=final_beta)


# --------------------------------------------------------------------------
# Pure-JAX reference (mirrors the PyTorch forward in training mode, dropout=0,
# WITH the Linear bias -- demonstrating the bias is cancelled by BN)
# --------------------------------------------------------------------------
def _bn_ref(y, gamma, beta):
    mean = jnp.mean(y, axis=0, keepdims=True)
    var = jnp.mean((y - mean) ** 2, axis=0, keepdims=True)
    return (y - mean) / jnp.sqrt(var + EPS) * gamma + beta


def mlp_stack_ref(x, params, *, residual, residual_full):
    out = x
    n_blocks = len(params["blocks"])
    for i, blk in enumerate(params["blocks"]):
        y = out @ blk["w"] + blk["b"]
        y = _bn_ref(y, blk["gamma"], blk["beta"])
        y = jnp.maximum(y, 0.0)
        if residual and (0 < i < n_blocks - 1):
            y = y + out
        out = y
    if residual_full:
        out = out + x
    out = _bn_ref(out, params["final_gamma"], params["final_beta"])
    return out


# --------------------------------------------------------------------------
if __name__ == "__main__":
    # MLPStack(input_size=32, hidden_size=32, output_size=32, depth=3,
    #          activation=ReLU, output_activation=ReLU, norm=True,
    #          residual=True, residual_full=True), batch=8, training mode.
    N, INPUT, HIDDEN, OUTPUT, DEPTH = 8, 32, 32, 32, 3
    RESIDUAL, RESIDUAL_FULL = True, True

    key = jax.random.PRNGKey(0)
    key, kx = jax.random.split(key)
    x = jax.random.normal(kx, (N, INPUT), jnp.float32)
    params = make_params(key, INPUT, HIDDEN, OUTPUT, DEPTH)

    out = mlp_stack_forward(x, params, residual=RESIDUAL,
                            residual_full=RESIDUAL_FULL)
    out = jax.block_until_ready(out)

    ref = mlp_stack_ref(x, params, residual=RESIDUAL,
                        residual_full=RESIDUAL_FULL)
    assert out.shape == (N, OUTPUT)
    assert jnp.allclose(out, ref, atol=1e-4, rtol=1e-4), "mismatch vs reference"

    print("KERNEL_OK")
</pallas_src>

<mosaic_0001>
module attributes {stable_mosaic.version = 11 : i64} {
  func.func @_fused_mlp_stack_kernel(%arg0: memref<8x128xf32, #tpu.memory_space<vmem>>, %arg1: memref<4x128x128xf32, #tpu.memory_space<vmem>>, %arg2: memref<5x1x128xf32, #tpu.memory_space<vmem>>, %arg3: memref<5x1x128xf32, #tpu.memory_space<vmem>>, %arg4: memref<8x128xf32, #tpu.memory_space<vmem>>) attributes {dimension_semantics = [], scalar_prefetch = 0 : i64, scratch_operands = 0 : i64, tpu.core_type = #tpu.core_type<tc>} {
    %c0 = arith.constant 0 : index
    %c0_0 = arith.constant 0 : index
    %0 = vector.load %arg0[%c0, %c0_0] : memref<8x128xf32, #tpu.memory_space<vmem>>, vector<8x128xf32>
    %c0_1 = arith.constant 0 : index
    %c0_2 = arith.constant 0 : index
    %c0_3 = arith.constant 0 : index
    %1 = vector.load %arg1[%c0_1, %c0_2, %c0_3] : memref<4x128x128xf32, #tpu.memory_space<vmem>>, vector<1x128x128xf32>
    %2 = vector.shape_cast %1 : vector<1x128x128xf32> to vector<128x128xf32>
    %cst = arith.constant dense<0.000000e+00> : vector<8x128xf32>
    %3 = tpu.matmul %0, %2, %cst {dimension_numbers = #tpu.dot_dimension_numbers<[1], [0], [0], [1], [0, 0, 1, 1], [], []>} : vector<8x128xf32>, vector<128x128xf32>, vector<8x128xf32> -> vector<8x128xf32>
    %c0_4 = arith.constant 0 : index
    %c0_5 = arith.constant 0 : index
    %c0_6 = arith.constant 0 : index
    %4 = vector.load %arg2[%c0_4, %c0_5, %c0_6] : memref<5x1x128xf32, #tpu.memory_space<vmem>>, vector<1x1x128xf32>
    %5 = vector.shape_cast %4 : vector<1x1x128xf32> to vector<1x128xf32>
    %c0_7 = arith.constant 0 : index
    %c0_8 = arith.constant 0 : index
    %c0_9 = arith.constant 0 : index
    %6 = vector.load %arg3[%c0_7, %c0_8, %c0_9] : memref<5x1x128xf32, #tpu.memory_space<vmem>>, vector<1x1x128xf32>
    %7 = vector.shape_cast %6 : vector<1x1x128xf32> to vector<1x128xf32>
    %cst_10 = arith.constant dense<0.000000e+00> : vector<128xf32>
    %8 = vector.multi_reduction <add>, %3, %cst_10 [0] : vector<8x128xf32> to vector<128xf32>
    %9 = vector.shape_cast %8 : vector<128xf32> to vector<1x128xf32>
    %10 = arith.mulf %3, %3 : vector<8x128xf32>
    %cst_11 = arith.constant dense<0.000000e+00> : vector<128xf32>
    %11 = vector.multi_reduction <add>, %10, %cst_11 [0] : vector<8x128xf32> to vector<128xf32>
    %12 = vector.shape_cast %11 : vector<128xf32> to vector<1x128xf32>
    %cst_12 = arith.constant 1.250000e-01 : f32
    %13 = vector.broadcast %cst_12 : f32 to vector<1x128xf32>
    %14 = arith.mulf %9, %13 : vector<1x128xf32>
    %cst_13 = arith.constant 1.250000e-01 : f32
    %15 = vector.broadcast %cst_13 : f32 to vector<1x128xf32>
    %16 = arith.mulf %12, %15 : vector<1x128xf32>
    %17 = arith.mulf %14, %14 : vector<1x128xf32>
    %18 = arith.subf %16, %17 : vector<1x128xf32>
    %cst_14 = arith.constant 9.99999974E-6 : f32
    %19 = vector.broadcast %cst_14 : f32 to vector<1x128xf32>
    %20 = arith.addf %18, %19 : vector<1x128xf32>
    %21 = math.rsqrt %20 : vector<1x128xf32>
    %22 = arith.mulf %5, %21 : vector<1x128xf32>
    %23 = arith.mulf %14, %22 : vector<1x128xf32>
    %24 = arith.subf %7, %23 : vector<1x128xf32>
    %25 = vector.broadcast %22 : vector<1x128xf32> to vector<8x128xf32>
    %26 = arith.mulf %3, %25 : vector<8x128xf32>
    %27 = vector.broadcast %24 : vector<1x128xf32> to vector<8x128xf32>
    %28 = arith.addf %26, %27 : vector<8x128xf32>
    %cst_15 = arith.constant 0.000000e+00 : f32
    %29 = vector.broadcast %cst_15 : f32 to vector<8x128xf32>
    %30 = arith.maximumf %28, %29 : vector<8x128xf32>
    %c1 = arith.constant 1 : index
    %c0_16 = arith.constant 0 : index
    %c0_17 = arith.constant 0 : index
    %31 = vector.load %arg1[%c1, %c0_16, %c0_17] : memref<4x128x128xf32, #tpu.memory_space<vmem>>, vector<1x128x128xf32>
    %32 = vector.shape_cast %31 : vector<1x128x128xf32> to vector<128x128xf32>
    %cst_18 = arith.constant dense<0.000000e+00> : vector<8x128xf32>
    %33 = tpu.matmul %30, %32, %cst_18 {dimension_numbers = #tpu.dot_dimension_numbers<[1], [0], [0], [1], [0, 0, 1, 1], [], []>} : vector<8x128xf32>, vector<128x128xf32>, vector<8x128xf32> -> vector<8x128xf32>
    %c1_19 = arith.constant 1 : index
    %c0_20 = arith.constant 0 : index
    %c0_21 = arith.constant 0 : index
    %34 = vector.load %arg2[%c1_19, %c0_20, %c0_21] : memref<5x1x128xf32, #tpu.memory_space<vmem>>, vector<1x1x128xf32>
    %35 = vector.shape_cast %34 : vector<1x1x128xf32> to vector<1x128xf32>
    %c1_22 = arith.constant 1 : index
    %c0_23 = arith.constant 0 : index
    %c0_24 = arith.constant 0 : index
    %36 = vector.load %arg3[%c1_22, %c0_23, %c0_24] : memref<5x1x128xf32, #tpu.memory_space<vmem>>, vector<1x1x128xf32>
    %37 = vector.shape_cast %36 : vector<1x1x128xf32> to vector<1x128xf32>
    %cst_25 = arith.constant dense<0.000000e+00> : vector<128xf32>
    %38 = vector.multi_reduction <add>, %33, %cst_25 [0] : vector<8x128xf32> to vector<128xf32>
    %39 = vector.shape_cast %38 : vector<128xf32> to vector<1x128xf32>
    %40 = arith.mulf %33, %33 : vector<8x128xf32>
    %cst_26 = arith.constant dense<0.000000e+00> : vector<128xf32>
    %41 = vector.multi_reduction <add>, %40, %cst_26 [0] : vector<8x128xf32> to vector<128xf32>
    %42 = vector.shape_cast %41 : vector<128xf32> to vector<1x128xf32>
    %cst_27 = arith.constant 1.250000e-01 : f32
    %43 = vector.broadcast %cst_27 : f32 to vector<1x128xf32>
    %44 = arith.mulf %39, %43 : vector<1x128xf32>
    %cst_28 = arith.constant 1.250000e-01 : f32
    %45 = vector.broadcast %cst_28 : f32 to vector<1x128xf32>
    %46 = arith.mulf %42, %45 : vector<1x128xf32>
    %47 = arith.mulf %44, %44 : vector<1x128xf32>
    %48 = arith.subf %46, %47 : vector<1x128xf32>
    %cst_29 = arith.constant 9.99999974E-6 : f32
    %49 = vector.broadcast %cst_29 : f32 to vector<1x128xf32>
    %50 = arith.addf %48, %49 : vector<1x128xf32>
    %51 = math.rsqrt %50 : vector<1x128xf32>
    %52 = arith.mulf %35, %51 : vector<1x128xf32>
    %53 = arith.mulf %44, %52 : vector<1x128xf32>
    %54 = arith.subf %37, %53 : vector<1x128xf32>
    %55 = vector.broadcast %52 : vector<1x128xf32> to vector<8x128xf32>
    %56 = arith.mulf %33, %55 : vector<8x128xf32>
    %57 = vector.broadcast %54 : vector<1x128xf32> to vector<8x128xf32>
    %58 = arith.addf %56, %57 : vector<8x128xf32>
    %cst_30 = arith.constant 0.000000e+00 : f32
    %59 = vector.broadcast %cst_30 : f32 to vector<8x128xf32>
    %60 = arith.maximumf %58, %59 : vector<8x128xf32>
    %61 = arith.addf %60, %30 : vector<8x128xf32>
    %c2 = arith.constant 2 : index
    %c0_31 = arith.constant 0 : index
    %c0_32 = arith.constant 0 : index
    %62 = vector.load %arg1[%c2, %c0_31, %c0_32] : memref<4x128x128xf32, #tpu.memory_space<vmem>>, vector<1x128x128xf32>
    %63 = vector.shape_cast %62 : vector<1x128x128xf32> to vector<128x128xf32>
    %cst_33 = arith.constant dense<0.000000e+00> : vector<8x128xf32>
    %64 = tpu.matmul %61, %63, %cst_33 {dimension_numbers = #tpu.dot_dimension_numbers<[1], [0], [0], [1], [0, 0, 1, 1], [], []>} : vector<8x128xf32>, vector<128x128xf32>, vector<8x128xf32> -> vector<8x128xf32>
    %c2_34 = arith.constant 2 : index
    %c0_35 = arith.constant 0 : index
    %c0_36 = arith.constant 0 : index
    %65 = vector.load %arg2[%c2_34, %c0_35, %c0_36] : memref<5x1x128xf32, #tpu.memory_space<vmem>>, vector<1x1x128xf32>
    %66 = vector.shape_cast %65 : vector<1x1x128xf32> to vector<1x128xf32>
    %c2_37 = arith.constant 2 : index
    %c0_38 = arith.constant 0 : index
    %c0_39 = arith.constant 0 : index
    %67 = vector.load %arg3[%c2_37, %c0_38, %c0_39] : memref<5x1x128xf32, #tpu.memory_space<vmem>>, vector<1x1x128xf32>
    %68 = vector.shape_cast %67 : vector<1x1x128xf32> to vector<1x128xf32>
    %cst_40 = arith.constant dense<0.000000e+00> : vector<128xf32>
    %69 = vector.multi_reduction <add>, %64, %cst_40 [0] : vector<8x128xf32> to vector<128xf32>
    %70 = vector.shape_cast %69 : vector<128xf32> to vector<1x128xf32>
    %71 = arith.mulf %64, %64 : vector<8x128xf32>
    %cst_41 = arith.constant dense<0.000000e+00> : vector<128xf32>
    %72 = vector.multi_reduction <add>, %71, %cst_41 [0] : vector<8x128xf32> to vector<128xf32>
    %73 = vector.shape_cast %72 : vector<128xf32> to vector<1x128xf32>
    %cst_42 = arith.constant 1.250000e-01 : f32
    %74 = vector.broadcast %cst_42 : f32 to vector<1x128xf32>
    %75 = arith.mulf %70, %74 : vector<1x128xf32>
    %cst_43 = arith.constant 1.250000e-01 : f32
    %76 = vector.broadcast %cst_43 : f32 to vector<1x128xf32>
    %77 = arith.mulf %73, %76 : vector<1x128xf32>
    %78 = arith.mulf %75, %75 : vector<1x128xf32>
    %79 = arith.subf %77, %78 : vector<1x128xf32>
    %cst_44 = arith.constant 9.99999974E-6 : f32
    %80 = vector.broadcast %cst_44 : f32 to vector<1x128xf32>
    %81 = arith.addf %79, %80 : vector<1x128xf32>
    %82 = math.rsqrt %81 : vector<1x128xf32>
    %83 = arith.mulf %66, %82 : vector<1x128xf32>
    %84 = arith.mulf %75, %83 : vector<1x128xf32>
    %85 = arith.subf %68, %84 : vector<1x128xf32>
    %86 = vector.broadcast %83 : vector<1x128xf32> to vector<8x128xf32>
    %87 = arith.mulf %64, %86 : vector<8x128xf32>
    %88 = vector.broadcast %85 : vector<1x128xf32> to vector<8x128xf32>
    %89 = arith.addf %87, %88 : vector<8x128xf32>
    %cst_45 = arith.constant 0.000000e+00 : f32
    %90 = vector.broadcast %cst_45 : f32 to vector<8x128xf32>
    %91 = arith.maximumf %89, %90 : vector<8x128xf32>
    %92 = arith.addf %91, %61 : vector<8x128xf32>
    %c3 = arith.constant 3 : index
    %c0_46 = arith.constant 0 : index
    %c0_47 = arith.constant 0 : index
    %93 = vector.load %arg1[%c3, %c0_46, %c0_47] : memref<4x128x128xf32, #tpu.memory_space<vmem>>, vector<1x128x128xf32>
    %94 = vector.shape_cast %93 : vector<1x128x128xf32> to vector<128x128xf32>
    %cst_48 = arith.constant dense<0.000000e+00> : vector<8x128xf32>
    %95 = tpu.matmul %92, %94, %cst_48 {dimension_numbers = #tpu.dot_dimension_numbers<[1], [0], [0], [1], [0, 0, 1, 1], [], []>} : vector<8x128xf32>, vector<128x128xf32>, vector<8x128xf32> -> vector<8x128xf32>
    %c3_49 = arith.constant 3 : index
    %c0_50 = arith.constant 0 : index
    %c0_51 = arith.constant 0 : index
    %96 = vector.load %arg2[%c3_49, %c0_50, %c0_51] : memref<5x1x128xf32, #tpu.memory_space<vmem>>, vector<1x1x128xf32>
    %97 = vector.shape_cast %96 : vector<1x1x128xf32> to vector<1x128xf32>
    %c3_52 = arith.constant 3 : index
    %c0_53 = arith.constant 0 : index
    %c0_54 = arith.constant 0 : index
    %98 = vector.load %arg3[%c3_52, %c0_53, %c0_54] : memref<5x1x128xf32, #tpu.memory_space<vmem>>, vector<1x1x128xf32>
    %99 = vector.shape_cast %98 : vector<1x1x128xf32> to vector<1x128xf32>
    %cst_55 = arith.constant dense<0.000000e+00> : vector<128xf32>
    %100 = vector.multi_reduction <add>, %95, %cst_55 [0] : vector<8x128xf32> to vector<128xf32>
    %101 = vector.shape_cast %100 : vector<128xf32> to vector<1x128xf32>
    %102 = arith.mulf %95, %95 : vector<8x128xf32>
    %cst_56 = arith.constant dense<0.000000e+00> : vector<128xf32>
    %103 = vector.multi_reduction <add>, %102, %cst_56 [0] : vector<8x128xf32> to vector<128xf32>
    %104 = vector.shape_cast %103 : vector<128xf32> to vector<1x128xf32>
    %cst_57 = arith.constant 1.250000e-01 : f32
    %105 = vector.broadcast %cst_57 : f32 to vector<1x128xf32>
    %106 = arith.mulf %101, %105 : vector<1x128xf32>
    %cst_58 = arith.constant 1.250000e-01 : f32
    %107 = vector.broadcast %cst_58 : f32 to vector<1x128xf32>
    %108 = arith.mulf %104, %107 : vector<1x128xf32>
    %109 = arith.mulf %106, %106 : vector<1x128xf32>
    %110 = arith.subf %108, %109 : vector<1x128xf32>
    %cst_59 = arith.constant 9.99999974E-6 : f32
    %111 = vector.broadcast %cst_59 : f32 to vector<1x128xf32>
    %112 = arith.addf %110, %111 : vector<1x128xf32>
    %113 = math.rsqrt %112 : vector<1x128xf32>
    %114 = arith.mulf %97, %113 : vector<1x128xf32>
    %115 = arith.mulf %106, %114 : vector<1x128xf32>
    %116 = arith.subf %99, %115 : vector<1x128xf32>
    %117 = vector.broadcast %114 : vector<1x128xf32> to vector<8x128xf32>
    %118 = arith.mulf %95, %117 : vector<8x128xf32>
    %119 = vector.broadcast %116 : vector<1x128xf32> to vector<8x128xf32>
    %120 = arith.addf %118, %119 : vector<8x128xf32>
    %cst_60 = arith.constant 0.000000e+00 : f32
    %121 = vector.broadcast %cst_60 : f32 to vector<8x128xf32>
    %122 = arith.maximumf %120, %121 : vector<8x128xf32>
    %123 = arith.addf %122, %0 : vector<8x128xf32>
    %c4 = arith.constant 4 : index
    %c0_61 = arith.constant 0 : index
    %c0_62 = arith.constant 0 : index
    %124 = vector.load %arg2[%c4, %c0_61, %c0_62] : memref<5x1x128xf32, #tpu.memory_space<vmem>>, vector<1x1x128xf32>
    %125 = vector.shape_cast %124 : vector<1x1x128xf32> to vector<1x128xf32>
    %c4_63 = arith.constant 4 : index
    %c0_64 = arith.constant 0 : index
    %c0_65 = arith.constant 0 : index
    %126 = vector.load %arg3[%c4_63, %c0_64, %c0_65] : memref<5x1x128xf32, #tpu.memory_space<vmem>>, vector<1x1x128xf32>
    %127 = vector.shape_cast %126 : vector<1x1x128xf32> to vector<1x128xf32>
    %cst_66 = arith.constant dense<0.000000e+00> : vector<128xf32>
    %128 = vector.multi_reduction <add>, %123, %cst_66 [0] : vector<8x128xf32> to vector<128xf32>
    %129 = vector.shape_cast %128 : vector<128xf32> to vector<1x128xf32>
    %130 = arith.mulf %123, %123 : vector<8x128xf32>
    %cst_67 = arith.constant dense<0.000000e+00> : vector<128xf32>
    %131 = vector.multi_reduction <add>, %130, %cst_67 [0] : vector<8x128xf32> to vector<128xf32>
    %132 = vector.shape_cast %131 : vector<128xf32> to vector<1x128xf32>
    %cst_68 = arith.constant 1.250000e-01 : f32
    %133 = vector.broadcast %cst_68 : f32 to vector<1x128xf32>
    %134 = arith.mulf %129, %133 : vector<1x128xf32>
    %cst_69 = arith.constant 1.250000e-01 : f32
    %135 = vector.broadcast %cst_69 : f32 to vector<1x128xf32>
    %136 = arith.mulf %132, %135 : vector<1x128xf32>
    %137 = arith.mulf %134, %134 : vector<1x128xf32>
    %138 = arith.subf %136, %137 : vector<1x128xf32>
    %cst_70 = arith.constant 9.99999974E-6 : f32
    %139 = vector.broadcast %cst_70 : f32 to vector<1x128xf32>
    %140 = arith.addf %138, %139 : vector<1x128xf32>
    %141 = math.rsqrt %140 : vector<1x128xf32>
    %142 = arith.mulf %125, %141 : vector<1x128xf32>
    %143 = arith.mulf %134, %142 : vector<1x128xf32>
    %144 = arith.subf %127, %143 : vector<1x128xf32>
    %145 = vector.broadcast %142 : vector<1x128xf32> to vector<8x128xf32>
    %146 = arith.mulf %123, %145 : vector<8x128xf32>
    %147 = vector.broadcast %144 : vector<1x128xf32> to vector<8x128xf32>
    %148 = arith.addf %146, %147 : vector<8x128xf32>
    %c0_71 = arith.constant 0 : index
    %c0_72 = arith.constant 0 : index
    %149 = vector.load %arg4[%c0_71, %c0_72] : memref<8x128xf32, #tpu.memory_space<vmem>>, vector<8x128xf32>
    tpu.vector_store %arg4[%c0_71, %c0_72], %148 {strides = array<i32>} : memref<8x128xf32, #tpu.memory_space<vmem>>, vector<8x128xf32>,
    return
  }
}

</mosaic_0001>

<bundles_post_ra>
// kernel: tpu_custom_call.1
= control target key start
LH: loop header
LB: loop body
LE: loop exit
PB: predicated region body
PF: predicated region fallthrough
CT: control target
= control target key end

     0   :  { %9 = vsyncpa [#allocation3], 0  ;;  %s678_s0 = inlined_call_operand.hbm [shape: f32[8,128], index: 0, kind: input, shape index: {}]   ;;  %s679_s1 = inlined_call_operand.hbm [shape: f32[4,128,128], index: 1, kind: input, shape index: {}]   ;;  %s680_s2 = inlined_call_operand.hbm [shape: f32[5,1,128], index: 2, kind: input, shape index: {}]   ;;  %s681_s3 = inlined_call_operand.hbm [shape: f32[5,1,128], index: 3, kind: input, shape index: {}]   ;;  %s682_s4 = inlined_call_operand.hbm [shape: f32[8,128], index: 4, kind: output, shape index: {}]  }
   0x1   :  { %10 = vsyncpa [#allocation6], 0 }
   0x2   :  { %11 = vsyncpa [#allocation9], 0  ;;  %s28_s17 = sshll.u32 %s679_s1, 4  ;;  %s29_s17 = int_to_ptr.hbm [resolvable:$true] %s28_s17 }
   0x3   :  { %12 = vsyncpa [#allocation4], 0  ;;  %s614_s18 = smov [#allocation5]   ;;  %s18_s22 = sshll.u32 %s678_s0, 4  ;;  %s19_s22 = int_to_ptr.hbm [resolvable:$true] %s18_s22 }
   0x4   :  { %s30_s19 = sshll.u32 %s614_s18, 4  ;;  %s615_s23 = smov 128   ;;  %s31_s19 = int_to_ptr.vmem [resolvable:$true] %s30_s19 }
   0x5   :  { %s616_s24 = smov 8   ;;  %s617_s25 = smov [#allocation2]  }
   0x6   :  { %36 = dma.hbm_to_vmem [thread:$0]  %s29_s17, 8192, %s31_s19, [#allocation6], %s615_s23, %s615_s23, %s616_s24  }
   0x7   :  { %s20_s26 = sshll.u32 %s617_s25, 4  ;;  %s41_s29 = sshll.u32 %s680_s2, 4  ;;  %s21_s26 = int_to_ptr.vmem [resolvable:$true] %s20_s26  ;;  %s42_s29 = int_to_ptr.hbm [resolvable:$true] %s41_s29 }
   0x8   :  { %23 = dma.hbm_to_vmem [thread:$0]  %s19_s22, 128, %s21_s26, [#allocation3]  }
   0x9   :  { %s618_s1 = smov [#allocation7]   ;;  %s54_s0 = sshll.u32 %s681_s3, 4  ;;  %s55_s0 = int_to_ptr.hbm [resolvable:$true] %s54_s0 }
   0xa   :  { %s43_s30 = sshll.u32 %s618_s1, 4  ;;  %s619_s7 = smov 16   ;;  %s44_s30 = int_to_ptr.vmem [resolvable:$true] %s43_s30 }
   0xb   :  { %s620_s8 = smov 1   ;;  %s621_s9 = smov [#allocation8]  }
   0xc   :  { %49 = dma.hbm_to_vmem [thread:$0]  %s42_s29, 80, %s44_s30, [#allocation6], %s619_s7, %s619_s7, %s620_s8  }
   0xd   :  { %s56_s10 = sshll.u32 %s621_s9, 4  ;;  %s57_s10 = int_to_ptr.vmem [resolvable:$true] %s56_s10 }
   0xe   :  { %62 = dma.hbm_to_vmem [thread:$0]  %s55_s0, 80, %s57_s10, [#allocation9], %s619_s7, %s619_s7, %s620_s8  }
   0xf   :  { %606 = dma.done.wait [#allocation3], 128  }
  0x10   :  { %607 = vsyncadd [#allocation3], 4294967168 }
  0x11   :  { %608 = dma.done.wait [#allocation6], 8272  }
  0x12   :  { %609 = vsyncadd [#allocation6], 4294959024 }
  0x13   :  { %610 = dma.done.wait [#allocation9], 80  }
  0x14   :  { %611 = vsyncadd [#allocation9], 4294967216  ;;  %v95_v0 = vld [vmem:[#allocation5 + $0x78] sm:$0xff]  ;;  %v94_v1 = vld [vmem:[#allocation5 + $0x70] sm:$0xff]  ;;  %s622_s2 = smov [#allocation10]   ;;  %s455_s13 = sshll.u32 %s682_s4, 4  ;;  %s456_s13 = int_to_ptr.hbm [resolvable:$true] %s455_s13 }
  0x15   :  { %96 = vmatpush.msra.mxu0 %v95_v0  ;;  %v93_v2 = vld [vmem:[#allocation5 + $0x68] sm:$0xff]  ;;  %v92_v3 = vld [vmem:[#allocation5 + $0x60] sm:$0xff]  ;;  %v91_v4 = vld [vmem:[#allocation5 + $0x58] sm:$0xff]  ;;  %s453_s3 = sshll.u32 %s622_s2, 4  ;;  %s454_s3 = int_to_ptr.vmem [resolvable:$true] %s453_s3 }
  0x16   :  { %v90_v5 = vld [vmem:[#allocation5 + $0x50] sm:$0xff]  ;;  %v89_v6 = vld [vmem:[#allocation5 + $0x48] sm:$0xff]  ;;  %v88_v7 = vld [vmem:[#allocation5 + $0x40] sm:$0xff] }
  0x17   :  { %97 = vmatpush.msra.mxu0 %v94_v1  ;;  %v87_v8 = vld [vmem:[#allocation5 + $0x38] sm:$0xff]  ;;  %v86_v9 = vld [vmem:[#allocation5 + $0x30] sm:$0xff]  ;;  %v85_v10 = vld [vmem:[#allocation5 + $0x28] sm:$0xff] }
  0x18   :  { %v84_v11 = vld [vmem:[#allocation5 + $0x20] sm:$0xff]  ;;  %v83_v12 = vld [vmem:[#allocation5 + $0x18] sm:$0xff]  ;;  %v82_v13 = vld [vmem:[#allocation5 + $0x10] sm:$0xff] }
  0x19   :  { %98 = vmatpush.msra.mxu0 %v93_v2  ;;  %v81_v14 = vld [vmem:[#allocation5 + $0x8] sm:$0xff]  ;;  %v80_v15 = vld [vmem:[#allocation5] sm:$0xff]  ;;  %v660_v16 = vld [vmem:[#allocation2] sm:$0xff] }
  0x1a   :  { %v174_v17 = vld [vmem:[#allocation5 + $0xf8] sm:$0xff]  ;;  %v173_v18 = vld [vmem:[#allocation5 + $0xf0] sm:$0xff]  ;;  %v172_v19 = vld [vmem:[#allocation5 + $0xe8] sm:$0xff] }
  0x1b   :  { %99 = vmatpush.msra.mxu0 %v92_v3  ;;  %175 = vmatpush.msra.mxu1 %v174_v17  ;;  %v171_v20 = vld [vmem:[#allocation5 + $0xe0] sm:$0xff]  ;;  %v170_v21 = vld [vmem:[#allocation5 + $0xd8] sm:$0xff]  ;;  %v169_v22 = vld [vmem:[#allocation5 + $0xd0] sm:$0xff] }
  0x1c   :  { %v168_v23 = vld [vmem:[#allocation5 + $0xc8] sm:$0xff]  ;;  %v167_v27 = vld [vmem:[#allocation5 + $0xc0] sm:$0xff]  ;;  %v166_v30 = vld [vmem:[#allocation5 + $0xb8] sm:$0xff] }
  0x1d   :  { %100 = vmatpush.msra.mxu0 %v91_v4  ;;  %176 = vmatpush.msra.mxu1 %v173_v18  ;;  %v165_v33 = vld [vmem:[#allocation5 + $0xb0] sm:$0xff]  ;;  %v164_v36 = vld [vmem:[#allocation5 + $0xa8] sm:$0xff]  ;;  %v163_v39 = vld [vmem:[#allocation5 + $0xa0] sm:$0xff] }
  0x1e   :  { %v162_v42 = vld [vmem:[#allocation5 + $0x98] sm:$0xff]  ;;  %v161_v43 = vld [vmem:[#allocation5 + $0x90] sm:$0xff]  ;;  %v160_v46 = vld [vmem:[#allocation5 + $0x88] sm:$0xff] }
  0x1f   :  { %101 = vmatpush.msra.mxu0 %v90_v5  ;;  %177 = vmatpush.msra.mxu1 %v172_v19  ;;  %v159_v49 = vld [vmem:[#allocation5 + $0x80] sm:$0xff]  ;;  %v256_v5 = vld [vmem:[#allocation5 + $0x178] sm:$0xff] }
  0x20   :  { %v116_v57 = vld [vmem:[#allocation7] sm:$0x1]  ;;  %v117_v61 = vld [vmem:[#allocation8] sm:$0x1]  ;;  %257 = vmatpush.msra.mxu2 %v256_v5 }
  0x21   :  { %102 = vmatpush.msra.mxu0 %v89_v6  ;;  %178 = vmatpush.msra.mxu1 %v171_v20  ;;  %v255_v6 = vld [vmem:[#allocation5 + $0x170] sm:$0xff]  ;;  %v249_v18 = vld [vmem:[#allocation5 + $0x140] sm:$0xff] }
  0x22   :  { %258 = vmatpush.msra.mxu2 %v255_v6 }
  0x23   :  { %103 = vmatpush.msra.mxu0 %v88_v7  ;;  %179 = vmatpush.msra.mxu1 %v170_v21  ;;  %v254_v7 = vld [vmem:[#allocation5 + $0x168] sm:$0xff]  ;;  %v248_v21 = vld [vmem:[#allocation5 + $0x138] sm:$0xff] }
  0x24   :  { %259 = vmatpush.msra.mxu2 %v254_v7  ;;  %v331_v7 = vld [vmem:[#allocation5 + $0x1c0] sm:$0xff] }
  0x25   :  { %104 = vmatpush.msra.mxu0 %v87_v8  ;;  %180 = vmatpush.msra.mxu1 %v169_v22  ;;  %v253_v8 = vld [vmem:[#allocation5 + $0x160] sm:$0xff] }
  0x26   :  { %260 = vmatpush.msra.mxu2 %v253_v8 }
  0x27   :  { %105 = vmatpush.msra.mxu0 %v86_v9  ;;  %181 = vmatpush.msra.mxu1 %v168_v23  ;;  %v252_v9 = vld [vmem:[#allocation5 + $0x158] sm:$0xff] }
  0x28   :  { %261 = vmatpush.msra.mxu2 %v252_v9 }
  0x29   :  { %106 = vmatpush.msra.mxu0 %v85_v10  ;;  %182 = vmatpush.msra.mxu1 %v167_v27  ;;  %v251_v10 = vld [vmem:[#allocation5 + $0x150] sm:$0xff]  ;;  %v246_v27 = vld [vmem:[#allocation5 + $0x128] sm:$0xff] }
  0x2a   :  { %262 = vmatpush.msra.mxu2 %v251_v10  ;;  %v330_v10 = vld [vmem:[#allocation5 + $0x1b8] sm:$0xff] }
  0x2b   :  { %107 = vmatpush.msra.mxu0 %v84_v11  ;;  %183 = vmatpush.msra.mxu1 %v166_v30  ;;  %v245_v30 = vld [vmem:[#allocation5 + $0x120] sm:$0xff] }
  0x2d   :  { %108 = vmatpush.msra.mxu0 %v83_v12  ;;  %184 = vmatpush.msra.mxu1 %v165_v33 }
  0x2f   :  { %109 = vmatpush.msra.mxu0 %v82_v13  ;;  %185 = vmatpush.msra.mxu1 %v164_v36 }
  0x31   :  { %110 = vmatpush.msra.mxu0 %v81_v14  ;;  %186 = vmatpush.msra.mxu1 %v163_v39  ;;  %v250_v14 = vld [vmem:[#allocation5 + $0x148] sm:$0xff]  ;;  %v241_v39 = vld [vmem:[#allocation5 + $0x100] sm:$0xff] }
  0x32   :  { %263 = vmatpush.msra.mxu2 %v250_v14 }
  0x33   :  { %111 = vmatpush.msra.mxu0 %v80_v15  ;;  %187 = vmatpush.msra.mxu1 %v162_v42 }
  0x34   :  { %112 = vmatmul.f32.vlgmr.msra.gmra.mxu0 %v660_v16  ;;  %264 = vmatpush.msra.mxu2 %v249_v18 }
  0x35   :  { %188 = vmatpush.msra.mxu1 %v161_v43 }
  0x36   :  { %265 = vmatpush.msra.mxu2 %v248_v21  ;;  %v326_v21 = vld [vmem:[#allocation5 + $0x198] sm:$0xff] }
  0x37   :  { %189 = vmatpush.msra.mxu1 %v160_v46  ;;  %v196_v46 = vld [vmem:[#allocation7 + $0x1] sm:$0x1] }
  0x39   :  { %190 = vmatpush.msra.mxu1 %v159_v49 }
  0xb1   :  { %v113_v24 = vpop.f32.mrf.mxu0 }
  0xb2   :  { %v118_v25 = vrot.slane %v113_v24, 4  ;;  %v124_v26 = vmul.f32 %v113_v24, %v113_v24 }
  0xb4   :  { %v119_v28 = vadd.f32 %v118_v25, %v113_v24  ;;  %v125_v29 = vrot.slane %v124_v26, 4 }
  0xb6   :  { %v120_v31 = vrot.slane %v119_v28, 2  ;;  %v126_v32 = vadd.f32 %v125_v29, %v124_v26 }
  0xb8   :  { %v121_v34 = vadd.f32 %v120_v31, %v119_v28  ;;  %v127_v35 = vrot.slane %v126_v32, 2  ;;  %v244_v31 = vld [vmem:[#allocation5 + $0x118] sm:$0xff] }
  0xba   :  { %v122_v37 = vrot.slane %v121_v34, 1  ;;  %v128_v38 = vadd.f32 %v127_v35, %v126_v32 }
  0xbc   :  { %v123_v40 = vadd.f32 %v122_v37, %v121_v34  ;;  %v129_v41 = vrot.slane %v128_v38, 1  ;;  %v243_v34 = vld [vmem:[#allocation5 + $0x110] sm:$0xff]  ;;  %v242_v37 = vld [vmem:[#allocation5 + $0x108] sm:$0xff] }
  0xbe   :  { %v130_v44 = vadd.f32 %v129_v41, %v128_v38  ;;  %v131_v45 = vmul.f32 0.125, %v123_v40 }
  0xc0   :  { %v132_v47 = vmul.f32 0.125, %v130_v44  ;;  %v133_v48 = vmul.f32 %v131_v45, %v131_v45 }
  0xc2   :  { %v134_v50 = vsub.f32 %v132_v47, %v133_v48 }
  0xc4   :  { %v135_v51 = vadd.f32 1e-05, %v134_v50  ;;  %v198_v50 = vld [vmem:[#allocation8 + $0x1] sm:$0x1] }
  0xc6   :  { %476 = vrsqrt.f32 %v135_v51  ;;  %vm142_vm1 = vweird.f32 %v135_v51 }
  0xcc   :  { %v477_v52 = vpop.eup %476 }
  0xcd   :  { %v137_v53 = vmul.f32 %v477_v52, %v135_v51  ;;  %vm143_vm0 = vweird.f32 %v477_v52 }
  0xce   :  { %vm144_vm2 = vmor %vm142_vm1, %vm143_vm0 }
  0xcf   :  { %v138_v54 = vmul.f32 %v477_v52, %v137_v53 }
  0xd1   :  { %v139_v55 = vmul.f32 0.5, %v138_v54 }
  0xd3   :  { %v140_v56 = vsub.f32 1.5, %v139_v55 }
  0xd5   :  { %v141_v58 = vmul.f32 %v477_v52, %v140_v56 }
  0xd7   :  { %v145_v59 = vsel %vm144_vm2, %v477_v52, %v141_v58 }
  0xd8   :  { %v146_v60 = vmul.f32 %v145_v59, %v116_v57  ;;  %v338_v59 = vld [vmem:[#allocation5 + $0x1f8] sm:$0xff] }
  0xd9   :  { %339 = vmatpush.msra.mxu3 %v338_v59 }
  0xda   :  { %v150_v62 = vperm.slane %v146_v60, 0  ;;  %v147_v63 = vmul.f32 %v146_v60, %v131_v45  ;;  %v337_v60 = vld [vmem:[#allocation5 + $0x1f0] sm:$0xff] }
  0xdb   :  { %340 = vmatpush.msra.mxu3 %v337_v60 }
  0xdc   :  { %v148_v0 = vsub.f32 %v117_v61, %v147_v63  ;;  %v152_v1 = vmul.f32 %v150_v62, %v113_v24  ;;  %v247_v24 = vld [vmem:[#allocation5 + $0x130] sm:$0xff]  ;;  %v336_v61 = vld [vmem:[#allocation5 + $0x1e8] sm:$0xff]  ;;  %v335_v62 = vld [vmem:[#allocation5 + $0x1e0] sm:$0xff] }
  0xdd   :  { %266 = vmatpush.msra.mxu2 %v247_v24  ;;  %341 = vmatpush.msra.mxu3 %v336_v61  ;;  %v334_v63 = vld [vmem:[#allocation5 + $0x1d8] sm:$0xff]  ;;  %v325_v24 = vld [vmem:[#allocation5 + $0x190] sm:$0xff] }
  0xde   :  { %v154_v2 = vperm.slane %v148_v0, 0  ;;  %v333_v0 = vld [vmem:[#allocation5 + $0x1d0] sm:$0xff] }
  0xdf   :  { %267 = vmatpush.msra.mxu2 %v246_v27  ;;  %342 = vmatpush.msra.mxu3 %v335_v62  ;;  %v324_v27 = vld [vmem:[#allocation5 + $0x188] sm:$0xff] }
  0xe0   :  { %v663_v3 = vadd.f32 %v154_v2, %v152_v1 }
  0xe1   :  { %268 = vmatpush.msra.mxu2 %v245_v30  ;;  %343 = vmatpush.msra.mxu3 %v334_v63 }
  0xe2   :  { %v157_v4 = vmax.f32 %v663_v3, 0.0  ;;  %v332_v3 = vld [vmem:[#allocation5 + $0x1c8] sm:$0xff] }
  0xe3   :  { %269 = vmatpush.msra.mxu2 %v244_v31  ;;  %344 = vmatpush.msra.mxu3 %v333_v0 }
  0xe4   :  { %191 = vmatmul.f32.vlgmr.msra.gmra.mxu1 %v157_v4 }
  0xe5   :  { %270 = vmatpush.msra.mxu2 %v243_v34  ;;  %345 = vmatpush.msra.mxu3 %v332_v3 }
  0xe7   :  { %271 = vmatpush.msra.mxu2 %v242_v37  ;;  %346 = vmatpush.msra.mxu3 %v331_v7 }
  0xe9   :  { %272 = vmatpush.msra.mxu2 %v241_v39  ;;  %347 = vmatpush.msra.mxu3 %v330_v10 }
 0x161   :  { %v192_v11 = vpop.f32.mrf.mxu1 }
 0x162   :  { %v199_v12 = vrot.slane %v192_v11, 4  ;;  %v205_v13 = vmul.f32 %v192_v11, %v192_v11 }
 0x164   :  { %v200_v15 = vadd.f32 %v199_v12, %v192_v11  ;;  %v206_v17 = vrot.slane %v205_v13, 4 }
 0x166   :  { %v201_v19 = vrot.slane %v200_v15, 2  ;;  %v207_v20 = vadd.f32 %v206_v17, %v205_v13  ;;  %v329_v13 = vld [vmem:[#allocation5 + $0x1b0] sm:$0xff]  ;;  %v328_v17 = vld [vmem:[#allocation5 + $0x1a8] sm:$0xff] }
 0x167   :  { %348 = vmatpush.msra.mxu3 %v329_v13  ;;  %v362_v13 = vld [vmem:[#allocation8 + $0x3] sm:$0x1] }
 0x168   :  { %v202_v22 = vadd.f32 %v201_v19, %v200_v15  ;;  %v208_v23 = vrot.slane %v207_v20, 2 }
 0x169   :  { %349 = vmatpush.msra.mxu3 %v328_v17 }
 0x16a   :  { %v203_v25 = vrot.slane %v202_v22, 1  ;;  %v209_v26 = vadd.f32 %v208_v23, %v207_v20  ;;  %v327_v20 = vld [vmem:[#allocation5 + $0x1a0] sm:$0xff] }
 0x16b   :  { %350 = vmatpush.msra.mxu3 %v327_v20 }
 0x16c   :  { %v204_v28 = vadd.f32 %v203_v25, %v202_v22  ;;  %v210_v29 = vrot.slane %v209_v26, 1 }
 0x16d   :  { %351 = vmatpush.msra.mxu3 %v326_v21 }
 0x16e   :  { %v211_v32 = vadd.f32 %v210_v29, %v209_v26  ;;  %v212_v33 = vmul.f32 0.125, %v204_v28  ;;  %v323_v29 = vld [vmem:[#allocation5 + $0x180] sm:$0xff] }
 0x16f   :  { %352 = vmatpush.msra.mxu3 %v325_v24 }
 0x170   :  { %v213_v35 = vmul.f32 0.125, %v211_v32  ;;  %v214_v36 = vmul.f32 %v212_v33, %v212_v33 }
 0x171   :  { %353 = vmatpush.msra.mxu3 %v324_v27 }
 0x172   :  { %v215_v38 = vsub.f32 %v213_v35, %v214_v36  ;;  %v278_v36 = vld [vmem:[#allocation7 + $0x2] sm:$0x1] }
 0x173   :  { %354 = vmatpush.msra.mxu3 %v323_v29 }
 0x174   :  { %v216_v40 = vadd.f32 1e-05, %v215_v38 }
 0x176   :  { %478 = vrsqrt.f32 %v216_v40  ;;  %vm223_vm4 = vweird.f32 %v216_v40 }
 0x17c   :  { %v479_v41 = vpop.eup %478 }
 0x17d   :  { %v218_v42 = vmul.f32 %v479_v41, %v216_v40  ;;  %vm224_vm3 = vweird.f32 %v479_v41  ;;  %v280_v40 = vld [vmem:[#allocation8 + $0x2] sm:$0x1] }
 0x17e   :  { %vm225_vm5 = vmor %vm223_vm4, %vm224_vm3 }
 0x17f   :  { %v219_v43 = vmul.f32 %v479_v41, %v218_v42 }
 0x181   :  { %v220_v44 = vmul.f32 0.5, %v219_v43 }
 0x183   :  { %v221_v45 = vsub.f32 1.5, %v220_v44 }
 0x185   :  { %v222_v47 = vmul.f32 %v479_v41, %v221_v45 }
 0x187   :  { %v226_v48 = vsel %vm225_vm5, %v479_v41, %v222_v47 }
 0x188   :  { %v227_v49 = vmul.f32 %v226_v48, %v196_v46 }
 0x18a   :  { %v231_v51 = vperm.slane %v227_v49, 0  ;;  %v228_v52 = vmul.f32 %v227_v49, %v212_v33 }
 0x18c   :  { %v229_v53 = vsub.f32 %v198_v50, %v228_v52  ;;  %v233_v54 = vmul.f32 %v231_v51, %v192_v11 }
 0x18e   :  { %v235_v55 = vperm.slane %v229_v53, 0 }
 0x190   :  { %v237_v56 = vadd.f32 %v235_v55, %v233_v54 }
 0x192   :  { %v238_v57 = vmax.f32 %v237_v56, 0.0 }
 0x194   :  { %v670_v58 = vadd.f32 %v238_v57, %v157_v4 }
 0x196   :  { %273 = vmatmul.f32.vlgmr.msra.gmra.mxu2 %v670_v58 }
 0x219   :  { %v274_v1 = vpop.f32.mrf.mxu2 }
 0x21a   :  { %v281_v2 = vrot.slane %v274_v1, 4  ;;  %v287_v5 = vmul.f32 %v274_v1, %v274_v1 }
 0x21c   :  { %v282_v4 = vadd.f32 %v281_v2, %v274_v1  ;;  %v288_v6 = vrot.slane %v287_v5, 4 }
 0x21e   :  { %v283_v8 = vrot.slane %v282_v4, 2  ;;  %v289_v9 = vadd.f32 %v288_v6, %v287_v5 }
 0x220   :  { %v284_v11 = vadd.f32 %v283_v8, %v282_v4  ;;  %v290_v12 = vrot.slane %v289_v9, 2 }
 0x222   :  { %v285_v14 = vrot.slane %v284_v11, 1  ;;  %v291_v15 = vadd.f32 %v290_v12, %v289_v9  ;;  %v360_v9 = vld [vmem:[#allocation7 + $0x3] sm:$0x1] }
 0x224   :  { %v286_v18 = vadd.f32 %v285_v14, %v284_v11  ;;  %v292_v19 = vrot.slane %v291_v15, 1 }
 0x226   :  { %v293_v22 = vadd.f32 %v292_v19, %v291_v15  ;;  %v294_v23 = vmul.f32 0.125, %v286_v18 }
 0x228   :  { %v295_v25 = vmul.f32 0.125, %v293_v22  ;;  %v296_v26 = vmul.f32 %v294_v23, %v294_v23 }
 0x22a   :  { %v297_v28 = vsub.f32 %v295_v25, %v296_v26 }
 0x22c   :  { %v298_v30 = vadd.f32 1e-05, %v297_v28 }
 0x22e   :  { %480 = vrsqrt.f32 %v298_v30  ;;  %vm305_vm7 = vweird.f32 %v298_v30 }
 0x234   :  { %v481_v31 = vpop.eup %480 }
 0x235   :  { %v300_v32 = vmul.f32 %v481_v31, %v298_v30  ;;  %vm306_vm6 = vweird.f32 %v481_v31 }
 0x236   :  { %vm307_vm8 = vmor %vm305_vm7, %vm306_vm6 }
 0x237   :  { %v301_v33 = vmul.f32 %v481_v31, %v300_v32 }
 0x239   :  { %v302_v34 = vmul.f32 0.5, %v301_v33 }
 0x23b   :  { %v303_v35 = vsub.f32 1.5, %v302_v34 }
 0x23d   :  { %v304_v37 = vmul.f32 %v481_v31, %v303_v35 }
 0x23f   :  { %v308_v38 = vsel %vm307_vm8, %v481_v31, %v304_v37 }
 0x240   :  { %v309_v39 = vmul.f32 %v308_v38, %v278_v36 }
 0x242   :  { %v313_v41 = vperm.slane %v309_v39, 0  ;;  %v310_v42 = vmul.f32 %v309_v39, %v294_v23 }
 0x244   :  { %v311_v43 = vsub.f32 %v280_v40, %v310_v42  ;;  %v315_v44 = vmul.f32 %v313_v41, %v274_v1 }
 0x246   :  { %v317_v45 = vperm.slane %v311_v43, 0 }
 0x248   :  { %v319_v46 = vadd.f32 %v317_v45, %v315_v44  ;;  %v405_v45 = vld [vmem:[#allocation7 + $0x4] sm:$0x1] }
 0x24a   :  { %v320_v47 = vmax.f32 %v319_v46, 0.0 }
 0x24c   :  { %v321_v48 = vadd.f32 %v320_v47, %v670_v58 }
 0x24e   :  { %355 = vmatmul.f32.vlgmr.msra.gmra.mxu3 %v321_v48 }
 0x2d1   :  { %v356_v49 = vpop.f32.mrf.mxu3 }
 0x2d2   :  { %v363_v50 = vrot.slane %v356_v49, 4  ;;  %v369_v51 = vmul.f32 %v356_v49, %v356_v49 }
 0x2d4   :  { %v364_v52 = vadd.f32 %v363_v50, %v356_v49  ;;  %v370_v53 = vrot.slane %v369_v51, 4 }
 0x2d6   :  { %v365_v54 = vrot.slane %v364_v52, 2  ;;  %v371_v55 = vadd.f32 %v370_v53, %v369_v51 }
 0x2d8   :  { %v366_v56 = vadd.f32 %v365_v54, %v364_v52  ;;  %v372_v57 = vrot.slane %v371_v55, 2 }
 0x2da   :  { %v367_v59 = vrot.slane %v366_v56, 1  ;;  %v373_v60 = vadd.f32 %v372_v57, %v371_v55 }
 0x2dc   :  { %v368_v61 = vadd.f32 %v367_v59, %v366_v56  ;;  %v374_v62 = vrot.slane %v373_v60, 1 }
 0x2de   :  { %v375_v63 = vadd.f32 %v374_v62, %v373_v60  ;;  %v376_v0 = vmul.f32 0.125, %v368_v61 }
 0x2e0   :  { %v377_v1 = vmul.f32 0.125, %v375_v63  ;;  %v378_v2 = vmul.f32 %v376_v0, %v376_v0 }
 0x2e2   :  { %v379_v5 = vsub.f32 %v377_v1, %v378_v2 }
 0x2e4   :  { %v380_v58 = vadd.f32 1e-05, %v379_v5 }
 0x2e6   :  { %482 = vrsqrt.f32 %v380_v58  ;;  %vm387_vm10 = vweird.f32 %v380_v58 }
 0x2ec   :  { %v483_v3 = vpop.eup %482 }
 0x2ed   :  { %v382_v4 = vmul.f32 %v483_v3, %v380_v58  ;;  %vm388_vm9 = vweird.f32 %v483_v3 }
 0x2ee   :  { %vm389_vm11 = vmor %vm387_vm10, %vm388_vm9 }
 0x2ef   :  { %v383_v6 = vmul.f32 %v483_v3, %v382_v4 }
 0x2f1   :  { %v384_v7 = vmul.f32 0.5, %v383_v6 }
 0x2f3   :  { %v385_v8 = vsub.f32 1.5, %v384_v7 }
 0x2f5   :  { %v386_v10 = vmul.f32 %v483_v3, %v385_v8 }
 0x2f7   :  { %v390_v11 = vsel %vm389_vm11, %v483_v3, %v386_v10 }
 0x2f8   :  { %v391_v12 = vmul.f32 %v390_v11, %v360_v9 }
 0x2fa   :  { %v392_v14 = vmul.f32 %v391_v12, %v376_v0  ;;  %v395_v15 = vperm.slane %v391_v12, 0 }
 0x2fc   :  { %v393_v17 = vsub.f32 %v362_v13, %v392_v14  ;;  %v397_v18 = vmul.f32 %v395_v15, %v356_v49  ;;  %v407_v49 = vld [vmem:[#allocation8 + $0x4] sm:$0x1] }
 0x2fe   :  { %v399_v19 = vperm.slane %v393_v17, 0 }
 0x300   :  { %v401_v20 = vadd.f32 %v399_v19, %v397_v18 }
 0x302   :  { %v402_v21 = vmax.f32 %v401_v20, 0.0 }
 0x304   :  { %v403_v22 = vadd.f32 %v402_v21, %v660_v16 }
 0x306   :  { %v408_v23 = vrot.slane %v403_v22, 4  ;;  %v414_v24 = vmul.f32 %v403_v22, %v403_v22 }
 0x308   :  { %v409_v25 = vadd.f32 %v408_v23, %v403_v22  ;;  %v415_v26 = vrot.slane %v414_v24, 4 }
 0x30a   :  { %v416_v27 = vadd.f32 %v415_v26, %v414_v24  ;;  %v410_v28 = vrot.slane %v409_v25, 2 }
 0x30c   :  { %v417_v29 = vrot.slane %v416_v27, 2  ;;  %v411_v30 = vadd.f32 %v410_v28, %v409_v25 }
 0x30e   :  { %v418_v31 = vadd.f32 %v417_v29, %v416_v27  ;;  %v412_v32 = vrot.slane %v411_v30, 1 }
 0x310   :  { %v413_v33 = vadd.f32 %v412_v32, %v411_v30  ;;  %v419_v34 = vrot.slane %v418_v31, 1 }
 0x312   :  { %v420_v35 = vadd.f32 %v419_v34, %v418_v31  ;;  %v421_v36 = vmul.f32 0.125, %v413_v33 }
 0x314   :  { %v422_v37 = vmul.f32 0.125, %v420_v35  ;;  %v423_v38 = vmul.f32 %v421_v36, %v421_v36 }
 0x316   :  { %v424_v39 = vsub.f32 %v422_v37, %v423_v38 }
 0x318   :  { %v425_v40 = vadd.f32 1e-05, %v424_v39 }
 0x31a   :  { %484 = vrsqrt.f32 %v425_v40  ;;  %vm432_vm13 = vweird.f32 %v425_v40 }
 0x320   :  { %v485_v16 = vpop.eup %484 }
 0x321   :  { %v427_v41 = vmul.f32 %v485_v16, %v425_v40  ;;  %vm433_vm12 = vweird.f32 %v485_v16 }
 0x322   :  { %vm434_vm14 = vmor %vm432_vm13, %vm433_vm12 }
 0x323   :  { %v428_v42 = vmul.f32 %v485_v16, %v427_v41 }
 0x325   :  { %v429_v43 = vmul.f32 0.5, %v428_v42 }
 0x327   :  { %v430_v44 = vsub.f32 1.5, %v429_v43 }
 0x329   :  { %v431_v46 = vmul.f32 %v485_v16, %v430_v44 }
 0x32b   :  { %v435_v47 = vsel %vm434_vm14, %v485_v16, %v431_v46 }
 0x32c   :  { %v436_v48 = vmul.f32 %v435_v47, %v405_v45 }
 0x32e   :  { %v437_v50 = vmul.f32 %v436_v48, %v421_v36  ;;  %v440_v51 = vperm.slane %v436_v48, 0 }
 0x330   :  { %v438_v52 = vsub.f32 %v407_v49, %v437_v50  ;;  %v442_v53 = vmul.f32 %v440_v51, %v403_v22 }
 0x332   :  { %v444_v54 = vperm.slane %v438_v52, 0 }
 0x334   :  { %v446_v55 = vadd.f32 %v444_v54, %v442_v53 }
 0x336   :  { %447 = vst [vmem:[#allocation10] sm:$0xff] %v446_v55 }
 0x337   :  { %458 = dma.vmem_to_hbm [thread:$0]  %s454_s3, 128, %s456_s13, [#allocation4]  }
 0x338   :  { %612 = dma.done.wait [#allocation4], 128  }
 0x339   :  { %613 = vsyncadd [#allocation4], 4294967168 }
 0x33a   :  { %463 = vsyncpa [#allocation3], 1 }
 0x33b   :  { %464 = vsyncpa [#allocation6], 1 }
 0x33c   :  { %465 = vsyncpa [#allocation9], 1 }
 0x33d   :  { %466 = vsyncpa [#allocation4], 1 }

</bundles_post_ra>
